<compile_context>
chip_gen: v7x
topology: tpu7x:2x2x1
jax: 0.10.0
libtpu: 0.0.40
codegen_flags: <defaults>
</compile_context>

<pallas_src>
import functools

import jax
import jax.numpy as jnp
import numpy as np
from jax import lax
from jax.experimental import pallas as pl
from jax.experimental.pallas import tpu as pltpu


def _round_up(x, m):
    return -(-x // m) * m


def _fusion_kernel(p_ref, wbd_ref, wf_ref, gn_ref, *rest,
                   BN, NB, C_out, Cg, HW, eps):
    """Processes BN images per grid step.

    p_ref  : (BN, K_pad, HW)    im2col patches, all NB branches stacked along K
    wbd_ref: (NB*C_out, K_pad)  block-diagonal branch conv weight
    wf_ref : (C_out, NB*C_out)  1x1 fusion conv weight
    gn_ref : (rows_pad, 2|3)    packed per-channel [gamma, beta, (bias)],
                                rows [0, NB*C_out) = branch stage,
                                rows [NB*C_out, NB*C_out+C_out) = fusion stage
    rest   : (gmb_ref, gmf_ref, o_ref) when Cg > 1 else (o_ref,)
    o_ref  : (BN, C_out, HW)    output, already NCHW-flattened
    """
    if Cg > 1:
        gmb_ref, gmf_ref, o_ref = rest
    else:
        gmb_ref = gmf_ref = None
        (o_ref,) = rest

    NBC = NB * C_out
    inv_n = 1.0 / float(HW * Cg)

    gn = gn_ref[...]                                  # (rows_pad, 2|3) f32
    gamma_b, beta_b = gn[:NBC, 0:1], gn[:NBC, 1:2]
    gamma_f, beta_f = gn[NBC:NBC + C_out, 0:1], gn[NBC:NBC + C_out, 1:2]
    if Cg > 1:
        bias_b = gn[:NBC, 2:3]
        bias_f = gn[NBC:NBC + C_out, 2:3]
    w_bd = wbd_ref[...]
    w_f = wf_ref[...]

    def gn_relu(y, gamma, beta, gm_ref):
        # y: (C, HW) f32; per-channel lane reductions (XLU), VPU normalize.
        s = jnp.sum(y, axis=1, keepdims=True)         # (C, 1)
        ss = jnp.sum(y * y, axis=1, keepdims=True)    # (C, 1)
        if Cg == 1:
            mean, meansq = s * inv_n, ss * inv_n      # one channel per group
        else:
            mean = jnp.dot(gm_ref[...], s, preferred_element_type=jnp.float32)
            meansq = jnp.dot(gm_ref[...], ss, preferred_element_type=jnp.float32)
        var = jnp.maximum(meansq - mean * mean, 0.0)  # clamp: cancellation-safe
        inv = lax.rsqrt(var + eps)
        return jnp.maximum((y - mean) * (inv * gamma) + beta, 0.0)

    for i in range(BN):
        # all NB dilated 3x3 convs as ONE matmul (block-diagonal weight).
        y = jnp.dot(w_bd, p_ref[i], preferred_element_type=jnp.float32)  # (NBC,HW)
        if Cg > 1:
            y = y + bias_b        # Cg == 1: bias is cancelled by GN -> dropped
        y = gn_relu(y, gamma_b, beta_b, gmb_ref)
        # 1x1 fusion conv over the stacked channels: ONE K=NBC matmul.
        z = jnp.dot(w_f, y.astype(w_f.dtype), preferred_element_type=jnp.float32)
        if Cg > 1:
            z = z + bias_f
        z = gn_relu(z, gamma_f, beta_f, gmf_ref)
        o_ref[i] = z.astype(o_ref.dtype)


def multi_branch_fusion_avg(x_nchw, params, rates=(1, 3, 5), num_groups=32,
                            eps=1e-5, batch_block=None, use_bf16_matmul=False):
    N, C_in, H, W = x_nchw.shape
    NB = len(rates)
    C_out = params["fusion_b"].shape[0]
    assert C_out % num_groups == 0
    Cg = C_out // num_groups
    NBC = NB * C_out
    HW = H * W
    K = NB * 9 * C_in
    K_pad = _round_up(K, 8)            # sublane-align the patches' K dim
    maxr = max(rates)

    mm_dtype = jnp.bfloat16 if use_bf16_matmul else jnp.float32

    # ---- layout plumbing (plain JAX, outside the kernel) ----
    xf = x_nchw.astype(jnp.float32)
    x_pad = jnp.pad(xf, ((0, 0), (0, 0), (maxr, maxr), (maxr, maxr)))

    # im2col, all branches stacked along K: (N, K, HW),
    # K index = b*9*C_in + (ky*3 + kx)*C_in + c.
    taps = []
    for r in rates:
        base = maxr - r                # conv padding == dilation => "same" output
        for ky in range(3):
            for kx in range(3):
                y0, x0 = base + ky * r, base + kx * r
                sl = x_pad[:, :, y0:y0 + H, x0:x0 + W]      # (N, C_in, H, W)
                taps.append(sl.reshape(N, 1, C_in, HW))
    patches = jnp.concatenate(taps, axis=1).reshape(N, K, HW)
    if K_pad > K:
        patches = jnp.pad(patches, ((0, 0), (0, K_pad - K), (0, 0)))
    patches = patches.astype(mm_dtype)

    # block-diagonal branch conv weight: (NBC, K_pad), zeros off-diagonal.
    w_br = jnp.transpose(params["branch_w"], (0, 1, 3, 4, 2)).reshape(
        NB, C_out, 9 * C_in)
    w_bd = jnp.zeros((NBC, K_pad), jnp.float32)
    for b in range(NB):
        w_bd = w_bd.at[b * C_out:(b + 1) * C_out,
                       b * 9 * C_in:(b + 1) * 9 * C_in].set(w_br[b])
    w_bd = w_bd.astype(mm_dtype)

    # fusion 1x1 weight: (C_out, NBC); columns match the stacked channel order.
    w_fu = params["fusion_w"][:, :, 0, 0].astype(mm_dtype)

    # packed per-channel GN params (+ conv biases only when Cg > 1; for Cg == 1
    # a conv bias is exactly cancelled by the GN mean subtraction).
    gamma_cat = jnp.concatenate([params["branch_gamma"].reshape(NBC),
                                 params["fusion_gamma"]])
    beta_cat = jnp.concatenate([params["branch_beta"].reshape(NBC),
                                params["fusion_beta"]])
    cols = [gamma_cat, beta_cat]
    if Cg > 1:
        bias_cat = jnp.concatenate([params["branch_b"].reshape(NBC),
                                    params["fusion_b"]])
        cols.append(bias_cat)
    gn_pack = jnp.stack(cols, axis=1).astype(jnp.float32)   # (NBC+C_out, 2|3)
    rows = NBC + C_out
    rows_pad = _round_up(rows, 8)
    if rows_pad > rows:
        gn_pack = jnp.pad(gn_pack, ((0, rows_pad - rows), (0, 0)))

    # group-averaging matrices: only built/passed when Cg > 1 (dead otherwise).
    extra_args = []
    if Cg > 1:
        gid = jnp.arange(C_out) // Cg
        gmf = (gid[:, None] == gid[None, :]).astype(jnp.float32) / float(HW * Cg)
        bid = jnp.arange(NBC) // C_out
        gidb = (jnp.arange(NBC) % C_out) // Cg
        gmb = ((bid[:, None] == bid[None, :]) &
               (gidb[:, None] == gidb[None, :])).astype(jnp.float32) / float(HW * Cg)
        extra_args = [gmb, gmf]

    # ---- batch blocking: amortize ~0.35us per grid step over BN images, but
    #      keep >= 2 grid steps (when N allows) so the "parallel" batch axis
    #      still shards across both TensorCores on v7x. ----
    if batch_block is None:
        steps = 2 if N >= 2 else 1
        BN = -(-N // steps)
    else:
        BN = max(1, int(batch_block))
    steps = -(-N // BN)
    N_pad = steps * BN
    if N_pad > N:
        patches = jnp.pad(patches, ((0, N_pad - N), (0, 0), (0, 0)))

    kernel = functools.partial(_fusion_kernel, BN=BN, NB=NB, C_out=C_out,
                               Cg=Cg, HW=HW, eps=eps)

    def full_spec(arr):
        nd = arr.ndim
        return pl.BlockSpec(arr.shape, lambda n, _nd=nd: (0,) * _nd)

    in_specs = [pl.BlockSpec((BN, K_pad, HW), lambda n: (n, 0, 0)),
                full_spec(w_bd), full_spec(w_fu), full_spec(gn_pack)]
    in_specs += [full_spec(a) for a in extra_args]

    # TODO(synk): for production shapes (e.g. C_in=256, HW=64x64) replace the
    #   wrapper-side im2col + whole-image block with a spatial (HW) grid axis,
    #   a two-pass GroupNorm scratch, and an explicit vmem_limit_bytes — the
    #   per-image patches would exceed v7x's 64 MiB VMEM otherwise.
    out_flat = pl.pallas_call(
        kernel,
        out_shape=jax.ShapeDtypeStruct((N_pad, C_out, HW), x_nchw.dtype),
        grid=(steps,),
        in_specs=in_specs,
        out_specs=pl.BlockSpec((BN, C_out, HW), lambda n: (n, 0, 0)),
        compiler_params=pltpu.CompilerParams(
            dimension_semantics=("parallel",)),
    )(patches, w_bd, w_fu, gn_pack, *extra_args)

    # Output is already NCHW-flattened: trim batch padding, unflatten spatial.
    return out_flat[:N].reshape(N, C_out, H, W)


# ---------------------- pure-JAX reference (NCHW) ----------------------
def ref_forward(x, params, rates=(1, 3, 5), num_groups=32, eps=1e-5):
    def group_norm(y, gamma, beta):
        N, C, H, W = y.shape
        G, Cg = num_groups, C // num_groups
        yg = y.reshape(N, G, Cg * H * W)
        mean = yg.mean(axis=2, keepdims=True)
        var = yg.var(axis=2, keepdims=True)
        yn = ((yg - mean) / jnp.sqrt(var + eps)).reshape(N, C, H, W)
        return yn * gamma[None, :, None, None] + beta[None, :, None, None]

    feats = []
    for b, r in enumerate(rates):
        y = lax.conv_general_dilated(
            x, params["branch_w"][b], window_strides=(1, 1),
            padding=[(r, r), (r, r)], rhs_dilation=(r, r),
            dimension_numbers=("NCHW", "OIHW", "NCHW"),
            precision=lax.Precision.HIGHEST)
        y = y + params["branch_b"][b][None, :, None, None]
        feats.append(jax.nn.relu(group_norm(y, params["branch_gamma"][b],
                                            params["branch_beta"][b])))
    cat = jnp.concatenate(feats, axis=1)
    z = lax.conv_general_dilated(
        cat, params["fusion_w"], window_strides=(1, 1), padding=[(0, 0), (0, 0)],
        dimension_numbers=("NCHW", "OIHW", "NCHW"),
        precision=lax.Precision.HIGHEST)
    z = z + params["fusion_b"][None, :, None, None]
    return jax.nn.relu(group_norm(z, params["fusion_gamma"],
                                  params["fusion_beta"]))


if __name__ == "__main__":
    # Small shapes consistent with the module: GroupNorm(32, C_out) => C_out = 32.
    N, C_in, H, W = 2, 4, 16, 16
    C_out, NB = 32, 3

    key = jax.random.PRNGKey(0)
    ks = jax.random.split(key, 9)
    params = {
        "branch_w": 0.1 * jax.random.normal(ks[0], (NB, C_out, C_in, 3, 3), jnp.float32),
        "branch_b": 0.1 * jax.random.normal(ks[1], (NB, C_out), jnp.float32),
        "branch_gamma": 1.0 + 0.1 * jax.random.normal(ks[2], (NB, C_out), jnp.float32),
        "branch_beta": 0.1 * jax.random.normal(ks[3], (NB, C_out), jnp.float32),
        "fusion_w": 0.1 * jax.random.normal(ks[4], (C_out, NB * C_out, 1, 1), jnp.float32),
        "fusion_b": 0.1 * jax.random.normal(ks[5], (C_out,), jnp.float32),
        "fusion_gamma": 1.0 + 0.1 * jax.random.normal(ks[6], (C_out,), jnp.float32),
        "fusion_beta": 0.1 * jax.random.normal(ks[7], (C_out,), jnp.float32),
    }
    x = jax.random.normal(ks[8], (N, C_in, H, W), jnp.float32)

    out = multi_branch_fusion_avg(x, params)
    out = jax.block_until_ready(out)

    ref = jax.block_until_ready(ref_forward(x, params))
    np.testing.assert_allclose(np.asarray(out), np.asarray(ref),
                               rtol=1e-3, atol=1e-3)
    print("KERNEL_OK")
</pallas_src>

<mosaic_0001>
module attributes {stable_mosaic.version = 11 : i64} {
  func.func @_fusion_kernel(%arg0: i32, %arg1: memref<1x112x256xf32, #tpu.memory_space<vmem>>, %arg2: memref<96x112xf32, #tpu.memory_space<vmem>>, %arg3: memref<32x96xf32, #tpu.memory_space<vmem>>, %arg4: memref<128x2xf32, #tpu.memory_space<vmem>>, %arg5: memref<1x32x256xf32, #tpu.memory_space<vmem>>) attributes {dimension_semantics = [#tpu.dimension_semantics<parallel>], iteration_bounds = array<i64: 2>, scalar_prefetch = 0 : i64, scratch_operands = 0 : i64, tpu.core_type = #tpu.core_type<tc>, window_params = [{transform_indices = @transform_0, window_bounds = array<i64: 1, 112, 256>}, {pipeline_mode = #tpu.pipeline_mode<synchronous>, transform_indices = @transform_1, window_bounds = array<i64: 96, 112>}, {pipeline_mode = #tpu.pipeline_mode<synchronous>, transform_indices = @transform_2, window_bounds = array<i64: 32, 96>}, {pipeline_mode = #tpu.pipeline_mode<synchronous>, transform_indices = @transform_3, window_bounds = array<i64: 128, 2>}, {transform_indices = @transform_4, window_bounds = array<i64: 1, 32, 256>}]} {
    %c0 = arith.constant 0 : index
    %c0_0 = arith.constant 0 : index
    %0 = vector.load %arg4[%c0, %c0_0] : memref<128x2xf32, #tpu.memory_space<vmem>>, vector<128x2xf32>
    %1 = vector.extract_strided_slice %0 {offsets = [0, 0], sizes = [96, 1], strides = [1, 1]} : vector<128x2xf32> to vector<96x1xf32>
    %2 = vector.extract_strided_slice %0 {offsets = [0, 1], sizes = [96, 1], strides = [1, 1]} : vector<128x2xf32> to vector<96x1xf32>
    %3 = vector.extract_strided_slice %0 {offsets = [96, 0], sizes = [32, 1], strides = [1, 1]} : vector<128x2xf32> to vector<32x1xf32>
    %4 = vector.extract_strided_slice %0 {offsets = [96, 1], sizes = [32, 1], strides = [1, 1]} : vector<128x2xf32> to vector<32x1xf32>
    %c0_1 = arith.constant 0 : index
    %c0_2 = arith.constant 0 : index
    %5 = vector.load %arg2[%c0_1, %c0_2] : memref<96x112xf32, #tpu.memory_space<vmem>>, vector<96x112xf32>
    %c0_3 = arith.constant 0 : index
    %c0_4 = arith.constant 0 : index
    %6 = vector.load %arg3[%c0_3, %c0_4] : memref<32x96xf32, #tpu.memory_space<vmem>>, vector<32x96xf32>
    %c0_5 = arith.constant 0 : index
    %c0_6 = arith.constant 0 : index
    %c0_7 = arith.constant 0 : index
    %7 = vector.load %arg1[%c0_5, %c0_6, %c0_7] : memref<1x112x256xf32, #tpu.memory_space<vmem>>, vector<1x112x256xf32>
    %8 = vector.shape_cast %7 : vector<1x112x256xf32> to vector<112x256xf32>
    %cst = arith.constant dense<0.000000e+00> : vector<96x256xf32>
    %9 = tpu.matmul %5, %8, %cst {dimension_numbers = #tpu.dot_dimension_numbers<[1], [0], [0], [1], [0, 0, 1, 1], [], []>} : vector<96x112xf32>, vector<112x256xf32>, vector<96x256xf32> -> vector<96x256xf32>
    %cst_8 = arith.constant dense<0.000000e+00> : vector<96xf32>
    %10 = vector.multi_reduction <add>, %9, %cst_8 [1] : vector<96x256xf32> to vector<96xf32>
    %11 = vector.shape_cast %10 : vector<96xf32> to vector<96x1xf32>
    %12 = arith.mulf %9, %9 : vector<96x256xf32>
    %cst_9 = arith.constant dense<0.000000e+00> : vector<96xf32>
    %13 = vector.multi_reduction <add>, %12, %cst_9 [1] : vector<96x256xf32> to vector<96xf32>
    %14 = vector.shape_cast %13 : vector<96xf32> to vector<96x1xf32>
    %cst_10 = arith.constant 3.906250e-03 : f32
    %15 = vector.broadcast %cst_10 : f32 to vector<96x1xf32>
    %16 = arith.mulf %11, %15 : vector<96x1xf32>
    %cst_11 = arith.constant 3.906250e-03 : f32
    %17 = vector.broadcast %cst_11 : f32 to vector<96x1xf32>
    %18 = arith.mulf %14, %17 : vector<96x1xf32>
    %19 = arith.mulf %16, %16 : vector<96x1xf32>
    %20 = arith.subf %18, %19 : vector<96x1xf32>
    %cst_12 = arith.constant 0.000000e+00 : f32
    %21 = vector.broadcast %cst_12 : f32 to vector<96x1xf32>
    %22 = arith.maximumf %20, %21 : vector<96x1xf32>
    %cst_13 = arith.constant 9.99999974E-6 : f32
    %23 = vector.broadcast %cst_13 : f32 to vector<96x1xf32>
    %24 = arith.addf %22, %23 : vector<96x1xf32>
    %25 = math.rsqrt %24 : vector<96x1xf32>
    %26 = vector.broadcast %16 : vector<96x1xf32> to vector<96x256xf32>
    %27 = arith.subf %9, %26 : vector<96x256xf32>
    %28 = arith.mulf %25, %1 : vector<96x1xf32>
    %29 = vector.broadcast %28 : vector<96x1xf32> to vector<96x256xf32>
    %30 = arith.mulf %27, %29 : vector<96x256xf32>
    %31 = vector.broadcast %2 : vector<96x1xf32> to vector<96x256xf32>
    %32 = arith.addf %30, %31 : vector<96x256xf32>
    %cst_14 = arith.constant 0.000000e+00 : f32
    %33 = vector.broadcast %cst_14 : f32 to vector<96x256xf32>
    %34 = arith.maximumf %32, %33 : vector<96x256xf32>
    %cst_15 = arith.constant dense<0.000000e+00> : vector<32x256xf32>
    %35 = tpu.matmul %6, %34, %cst_15 {dimension_numbers = #tpu.dot_dimension_numbers<[1], [0], [0], [1], [0, 0, 1, 1], [], []>} : vector<32x96xf32>, vector<96x256xf32>, vector<32x256xf32> -> vector<32x256xf32>
    %cst_16 = arith.constant dense<0.000000e+00> : vector<32xf32>
    %36 = vector.multi_reduction <add>, %35, %cst_16 [1] : vector<32x256xf32> to vector<32xf32>
    %37 = vector.shape_cast %36 : vector<32xf32> to vector<32x1xf32>
    %38 = arith.mulf %35, %35 : vector<32x256xf32>
    %cst_17 = arith.constant dense<0.000000e+00> : vector<32xf32>
    %39 = vector.multi_reduction <add>, %38, %cst_17 [1] : vector<32x256xf32> to vector<32xf32>
    %40 = vector.shape_cast %39 : vector<32xf32> to vector<32x1xf32>
    %cst_18 = arith.constant 3.906250e-03 : f32
    %41 = vector.broadcast %cst_18 : f32 to vector<32x1xf32>
    %42 = arith.mulf %37, %41 : vector<32x1xf32>
    %cst_19 = arith.constant 3.906250e-03 : f32
    %43 = vector.broadcast %cst_19 : f32 to vector<32x1xf32>
    %44 = arith.mulf %40, %43 : vector<32x1xf32>
    %45 = arith.mulf %42, %42 : vector<32x1xf32>
    %46 = arith.subf %44, %45 : vector<32x1xf32>
    %cst_20 = arith.constant 0.000000e+00 : f32
    %47 = vector.broadcast %cst_20 : f32 to vector<32x1xf32>
    %48 = arith.maximumf %46, %47 : vector<32x1xf32>
    %cst_21 = arith.constant 9.99999974E-6 : f32
    %49 = vector.broadcast %cst_21 : f32 to vector<32x1xf32>
    %50 = arith.addf %48, %49 : vector<32x1xf32>
    %51 = math.rsqrt %50 : vector<32x1xf32>
    %52 = vector.broadcast %42 : vector<32x1xf32> to vector<32x256xf32>
    %53 = arith.subf %35, %52 : vector<32x256xf32>
    %54 = arith.mulf %51, %3 : vector<32x1xf32>
    %55 = vector.broadcast %54 : vector<32x1xf32> to vector<32x256xf32>
    %56 = arith.mulf %53, %55 : vector<32x256xf32>
    %57 = vector.broadcast %4 : vector<32x1xf32> to vector<32x256xf32>
    %58 = arith.addf %56, %57 : vector<32x256xf32>
    %cst_22 = arith.constant 0.000000e+00 : f32
    %59 = vector.broadcast %cst_22 : f32 to vector<32x256xf32>
    %60 = arith.maximumf %58, %59 : vector<32x256xf32>
    %c0_23 = arith.constant 0 : index
    %c0_24 = arith.constant 0 : index
    %c0_25 = arith.constant 0 : index
    %61 = vector.load %arg5[%c0_23, %c0_24, %c0_25] : memref<1x32x256xf32, #tpu.memory_space<vmem>>, vector<1x32x256xf32>
    %62 = vector.shape_cast %61 : vector<1x32x256xf32> to vector<32x256xf32>
    %63 = vector.shape_cast %60 : vector<32x256xf32> to vector<1x32x256xf32>
    tpu.vector_store %arg5[%c0_23, %c0_24, %c0_25], %63 {strides = array<i32>} : memref<1x32x256xf32, #tpu.memory_space<vmem>>, vector<1x32x256xf32>,
    return
  }
  func.func @transform_0(%arg0: i32) -> (i32, i32, i32) {
    %c0_i32 = arith.constant 0 : i32
    %c0_i32_0 = arith.constant 0 : i32
    %c0_i32_1 = arith.constant 0 : i32
    return %arg0, %c0_i32, %c0_i32_0 : i32, i32, i32
  }
  func.func @transform_1(%arg0: i32) -> (i32, i32) {
    %c0_i32 = arith.constant 0 : i32
    %c0_i32_0 = arith.constant 0 : i32
    %c0_i32_1 = arith.constant 0 : i32
    return %c0_i32, %c0_i32_0 : i32, i32
  }
  func.func @transform_2(%arg0: i32) -> (i32, i32) {
    %c0_i32 = arith.constant 0 : i32
    %c0_i32_0 = arith.constant 0 : i32
    %c0_i32_1 = arith.constant 0 : i32
    return %c0_i32, %c0_i32_0 : i32, i32
  }
  func.func @transform_3(%arg0: i32) -> (i32, i32) {
    %c0_i32 = arith.constant 0 : i32
    %c0_i32_0 = arith.constant 0 : i32
    %c0_i32_1 = arith.constant 0 : i32
    return %c0_i32, %c0_i32_0 : i32, i32
  }
  func.func @transform_4(%arg0: i32) -> (i32, i32, i32) {
    %c0_i32 = arith.constant 0 : i32
    %c0_i32_0 = arith.constant 0 : i32
    %c0_i32_1 = arith.constant 0 : i32
    return %arg0, %c0_i32, %c0_i32_0 : i32, i32, i32
  }
}

</mosaic_0001>

<bundles_post_ra>
// kernel: tpu_custom_call.1
= control target key start
LH: loop header
LB: loop body
LE: loop exit
PB: predicated region body
PF: predicated region fallthrough
CT: control target
= control target key end

     0   :  { %9 = vsyncpa [#allocation3], 0  ;;  %s2263_s0 = inlined_call_operand.hbm [shape: f32[2,112,256], index: 0, kind: input, shape index: {}]   ;;  %s2264_s1 = inlined_call_operand.vmem [shape: f32[96,112], index: 1, kind: input, shape index: {}]   ;;  %s2265_s2 = inlined_call_operand.vmem [shape: f32[32,96], index: 2, kind: input, shape index: {}]   ;;  %s2266_s3 = inlined_call_operand.vmem [shape: f32[128,2], index: 3, kind: input, shape index: {}]   ;;  %s2267_s4 = inlined_call_operand.hbm [shape: f32[2,32,256], index: 4, kind: output, shape index: {}]  }
   0x1   :  { %11 = vsyncpa [#allocation3 + $0x1], 0 }
   0x2   :  { %12 = vsyncpa [#allocation4], 0 }
   0x3   :  { %14 = vsyncpa [#allocation4 + $0x1], 0  ;;  %s1505_s15 = smov 0   ;;  %s1507_s16 = smov 0  }
   0x4   :  { %s1509_s17 = smov 0   ;;  %s1511_s18 = smov 0  }
   0x5 LB: > { %s1526_s19 = sadd.s32 4294967295, %s1469_s18   ;;  %s1191_s20 = sadd.s32 4294967294, %s1469_s18   ;;  %s1469_s18 = sphi %s1511_s18, %s2305_s18   ;;  %s1465_s17 = sphi %s1509_s17, %s2304_s17   ;;  %s1461_s16 = sphi %s1507_s16, %s2303_s16   ;;  %s1457_s15 = sphi %s1505_s15, %s2302_s15  }
   0x6   : > { %s1530_s21 = sadd.s32 1, %s1469_s18   ;;  %s27_s22 = sadd.s32 1, %s1465_s17 }
   0x7   : > { %s24_s23 = ssub.s32 %s1469_s18, %s1530_s21  ;;  %p34_p0 = scmp.ne.s32.totalorder %s1465_s17, %s1461_s16 }
   0x8   : > { %p25_p1 = scmp.eq.s32.totalorder %s24_s23, 0  ;;  %p35_p2 = scmp.eq.s32.totalorder %s1469_s18, 0 }
   0x9   : > { %p40_p3 = scmp.ne.s32.totalorder %s1461_s16, %s1457_s15  ;;  %p41_p4 = scmp.eq.s32.totalorder %s1526_s19, 0 }
   0xa   : > { %s1542_s24 = scalar_select %p25_p1, %s1465_s17, %s27_s22  }
   0xb   : > { %p36_p5 = por %p35_p2, %p34_p0  ;;  %p1544_p6 = por %p41_p4, %p40_p3 }
   0xc   : > { %p127_p7 = scmp.eq.s32.totalorder %s1526_s19, 1  ;;  %p133_p8 = scmp.eq.s32.totalorder %s1191_s20, 1 }
   0xd   : > { %p1286_p10 = scmp.lt.s32.totalorder %s1469_s18, 2  ;;  %s162_s28 = sand.u32 1, %s1465_s17  }
   0xe   : > { %p1551_p11 = por %p127_p7, %p34_p0  ;;  %p1555_p12 = por %p133_p8, %p40_p3 }
   0xf   : > { %s1272_s29 = smul.u32 3584, %s1469_s18  ;;  %p1566_p13 = pnand %p1286_p10, %p36_p5 }
  0x10   : > { %s2275_s26 = scalar_select %p1551_p11, 1, 0 }
  0x11   : > { %s2276_s27 = scalar_select %p1555_p12, 1, 0 }
  0x12   : > { %s1271_s30 = smul.u32 224, %s162_s28  ;;  %s1564_s7 = scalar_lea.hbm %s2263_s0, %s1272_s29 }
  0x13   : > { %s1572_s11 = scalar_lea.sflag [#allocation3], %s162_s28  ;;  %s1373_s12 = scalar_lea.hbm %s1564_s7, 3584 }
  0x14   : > { %s166_s9 = scalar_lea.vmem [#allocation2], %s1271_s30  ;;  %p1374_p0 = scmp.ne.s32.totalorder %s1564_s7, %s1373_s12 }
  0x15   : > { %s173_s10 = sshll.u32 %s166_s9, 4  ;;  %p1375_p1 = pneg %p1566_p13  ;;  %s1570_s10 = int_to_ptr.vmem [resolvable:$true] %s173_s10 }
  0x16   : > { %s1378_s20 = scalar_lea.hbm %s2263_s0, 7168  ;;  %p1379_p4 = scmp.lt.u32.totalorder %s1564_s7, %s2263_s0 }
  0x17   : > { %p1376_p2 = pnand %p1375_p1, %p1374_p0  ;;  %p1380_p5 = scmp.lt.u32.totalorder %s1378_s20, %s1373_s12 }
  0x18   : > { %p1382_p8 = scmp.lt.u32.totalorder %s1373_s12, %s1564_s7 }
  0x19   : > { %p1377_p3 = pneg %p1376_p2  ;;  %p1381_p7 = por %p1380_p5, %p1379_p4 }
  0x1b   : > { %p1383_p10 = por %p1382_p8, %p1381_p7 }
  0x1d   : > { %p1384_p9 = pnand %p1383_p10, %p1377_p3 }
  0x1f   : > { %1387 = shalt.err (!%p1384_p9)
}
  0x20   : > { %s1388_s28 = scalar_lea.vmem %s1570_s10, 3584  ;;  %s1471_s29 = smov [#allocation2]  }
  0x21   : > { %p1389_p0 = scmp.ne.s32.totalorder %s1570_s10, %s1388_s28  ;;  %s1393_s30 = sshll.u32 %s1471_s29, 4  ;;  %s1394_s30 = int_to_ptr.vmem [resolvable:$false] %s1393_s30 }
  0x22   : > { %s1395_s5 = scalar_lea.vmem %s1394_s30, 7168  ;;  %p1396_p11 = scmp.lt.s32.totalorder %s1570_s10, %s1394_s30 }
  0x23   : > { %p1391_p2 = pnand %p1389_p0, %p1375_p1  ;;  %p1397_p4 = scmp.lt.s32.totalorder %s1395_s5, %s1388_s28 }
  0x25   : > { %p1392_p12 = pneg %p1391_p2  ;;  %p1398_p5 = por %p1397_p4, %p1396_p11 }
  0x27   : > { %p1399_p7 = pnand %p1398_p5, %p1392_p12 }
  0x29   : > { %1402 = shalt.err (!%p1399_p7)
}
  0x2a   : > { %s1472_s6 = smov 256   ;;  %s1473_s9 = smov 16  }
  0x2b   : > { %1281 = dma.hbm_to_vmem [thread:$0]  (!%p1566_p13), %s1564_s7, 3584, %s1570_s10, %s1572_s11, %s1472_s6, %s1472_s6, %s1473_s9  }
  0x2c   : > { %p1195_p9 = scmp.ge.s32.totalorder %s1469_s18, 1  ;;  %p181_p1 = scmp.lt.s32.totalorder %s1469_s18, 3 }
  0x2e   : > { %p182_p3 = pnand %p1195_p9, %p181_p1 }
  0x2f   : > { %s1603_s12 = sand.u32 (!%p182_p3), 1, %s1461_s16  }
  0x30   : > { %185 = sbr.rel (%p182_p3) target bundleno = 1259 (0x4eb), region = 36  ;;  %s188_s14 = scalar_lea.sflag (!%p182_p3), [#allocation3], %s1603_s12 }
  0x31   : > { %s1273_s13 = smul.u32 (!%p182_p3), 224, %s1603_s12 }
  0x33   : > { %s1607_s20 = scalar_lea.vmem (!%p182_p3), [#allocation2], %s1273_s13 }
  0x37   : > { %1448 = dma.done.wait (%p1544_p6), %s188_s14, 3584  }
  0x38   : > { %1450 = vsyncadd (%p1544_p6), %s188_s14, 4294963712  ;;  %v2269_v0 = vmov 0.0   ;;  %v249_v1 = vld [vmem:[%s1607_s20 + $0x8] sm:$0xff]  ;;  %v251_v2 = vld [vmem:[%s1607_s20 + $0x18] sm:$0xff]  ;;  %vm276_vm0 = vcmask 916480   ;;  %v2272_v55 = vmov 1  }
  0x39   : > { %377 = vmatprep.mubr.f32.mxu0 %v2269_v0  ;;  %935 = vmatprep.mubr.f32.mxu1 %v2269_v0  ;;  %v248_v3 = vld [vmem:[%s1607_s20] sm:$0xff]  ;;  %v1219_v4 = vpack.c.bf16 %v251_v2, %v249_v1  ;;  %v250_v5 = vld [vmem:[%s1607_s20 + $0x10] sm:$0xff]  ;;  %v253_v6 = vld [vmem:[%s1607_s20 + $0x28] sm:$0xff]  ;;  %vm858_vm1 = vcmask 785408   ;;  %s1196_s25 = sshll.u32 %s1603_s12, 6  ;;  %s1218_s10 = sshll.u32 %s1526_s19, 10 }
  0x3a   : > { %v255_v7 = vld [vmem:[%s1607_s20 + $0x38] sm:$0xff]  ;;  %v1221_v8 = vpack.c.bf16 %v250_v5, %v248_v3  ;;  %v252_v10 = vld [vmem:[%s1607_s20 + $0x20] sm:$0xff]  ;;  %v254_v11 = vld [vmem:[%s1607_s20 + $0x30] sm:$0xff]  ;;  %1327 = vset.pattern.permute.xlu1 %v2272_v55  ;;  %1328 = vset.pattern.permute.xlu0 %v2272_v55  ;;  %s2190_s7 = scalar_lea.vmem [#allocation5], %s1196_s25  ;;  %s2217_s23 = scalar_lea.hbm %s2267_s4, %s1218_s10 }
  0x3b   : > { %v1223_v9 = vpack.c.bf16 %v255_v7, %v253_v6  ;;  %v257_v12 = vld [vmem:[%s1607_s20 + $0x48] sm:$0xff]  ;;  %1220 = vmatprep.subr.bf16.mxu0 %v1219_v4  ;;  %v259_v13 = vld [vmem:[%s1607_s20 + $0x58] sm:$0xff]  ;;  %v1225_v14 = vpack.c.bf16 %v254_v11, %v252_v10  ;;  %v256_v16 = vld [vmem:[%s1607_s20 + $0x40] sm:$0xff]  ;;  %s1118_s8 = sshll.u32 %s2190_s7, 4  ;;  %s1105_s28 = scalar_lea.sflag [#allocation4], %s1603_s12  ;;  %s2212_s8 = int_to_ptr.vmem [resolvable:$true] %s1118_s8 }
  0x3c   : > { %1222 = vmatpush1.bf16.msra.mxu0 %v1221_v8  ;;  %v1227_v15 = vpack.c.bf16 %v259_v13, %v257_v12  ;;  %v258_v17 = vld [vmem:[%s1607_s20 + $0x50] sm:$0xff]  ;;  %v261_v18 = vld [vmem:[%s1607_s20 + $0x68] sm:$0xff]  ;;  %v263_v19 = vld [vmem:[%s1607_s20 + $0x78] sm:$0xff]  ;;  %s1403_s29 = scalar_lea.vmem %s2212_s8, 1024  ;;  %p2299_p11 = scmp.ne.s32.totalorder %s2275_s26, 0 }
  0x3d   : > { %1224 = vmatprep.subr.bf16.mxu0 %v1223_v9  ;;  %v1229_v20 = vpack.c.bf16 %v258_v17, %v256_v16  ;;  %v1231_v21 = vpack.c.bf16 %v263_v19, %v261_v18  ;;  %v260_v22 = vld [vmem:[%s1607_s20 + $0x60] sm:$0xff]  ;;  %v262_v23 = vld [vmem:[%s1607_s20 + $0x70] sm:$0xff]  ;;  %v265_v24 = vld [vmem:[%s1607_s20 + $0x88] sm:$0xff]  ;;  %p1404_p6 = scmp.ne.s32.totalorder %s2212_s8, %s1403_s29  ;;  %s1477_s19 = smov [#allocation5]  }
  0x3e   : > { %v267_v25 = vld [vmem:[%s1607_s20 + $0x98] sm:$0xff]  ;;  %v1233_v26 = vpack.c.bf16 %v262_v23, %v260_v22  ;;  %v264_v28 = vld [vmem:[%s1607_s20 + $0x80] sm:$0xff]  ;;  %v266_v29 = vld [vmem:[%s1607_s20 + $0x90] sm:$0xff]  ;;  %s1407_s30 = sshll.u32 %s1477_s19, 4  ;;  %s1408_s30 = int_to_ptr.vmem [resolvable:$false] %s1407_s30 }
  0x3f   : > { %v1235_v27 = vpack.c.bf16 %v267_v25, %v265_v24  ;;  %v269_v30 = vld [vmem:[%s1607_s20 + $0xa8] sm:$0xff]  ;;  %v271_v31 = vld [vmem:[%s1607_s20 + $0xb8] sm:$0xff]  ;;  %v1237_v32 = vpack.c.bf16 %v266_v29, %v264_v28  ;;  %v268_v34 = vld [vmem:[%s1607_s20 + $0xa0] sm:$0xff]  ;;  %p1405_p12 = pnand %p1404_p6, %p2299_p11  ;;  %s1409_s5 = scalar_lea.vmem %s1408_s30, 2048 }
  0x40   : > { %1226 = vmatpush1.bf16.msra.mxu0 %v1225_v14  ;;  %v1239_v33 = vpack.c.bf16 %v271_v31, %v269_v30  ;;  %v270_v35 = vld [vmem:[%s1607_s20 + $0xb0] sm:$0xff]  ;;  %v273_v36 = vld [vmem:[%s1607_s20 + $0xc8] sm:$0xff]  ;;  %v275_v37 = vld [vmem:[%s1607_s20 + $0xd8] sm:$0xff]  ;;  %p1410_p8 = scmp.lt.s32.totalorder %s2212_s8, %s1408_s30  ;;  %p1411_p10 = scmp.lt.s32.totalorder %s1409_s5, %s1403_s29 }
  0x41   : > { %1228 = vmatprep.subr.bf16.mxu0 %v1227_v15  ;;  %v1241_v38 = vpack.c.bf16 %v270_v35, %v268_v34  ;;  %v1243_v39 = vpack.c.bf16 %v275_v37, %v273_v36  ;;  %v272_v40 = vld [vmem:[%s1607_s20 + $0xc0] sm:$0xff]  ;;  %v274_v41 = vld [vmem:[%s1607_s20 + $0xd0] sm:$0xff]  ;;  %v233_v44 = vld [vmem:[%s2264_s1 + $0x8] sm:$0xff]  ;;  %p1406_p13 = pneg %p1405_p12 }
  0x42   : > { %v1245_v42 = vpack.c.bf16 %v274_v41, %v272_v40  ;;  %v232_v43 = vld [vmem:[%s2264_s1] sm:$0xff]  ;;  %v234_v45 = vld [vmem:[%s2264_s1 + $0x10] sm:$0xff]  ;;  %v235_v46 = vld [vmem:[%s2264_s1 + $0x18] sm:$0xff]  ;;  %p1412_p0 = por %p1411_p10, %p1410_p8 }
  0x43   : > { %v236_v47 = vld [vmem:[%s2264_s1 + $0x20] sm:$0xff]  ;;  %v237_v48 = vld [vmem:[%s2264_s1 + $0x28] sm:$0xff]  ;;  %v238_v49 = vld [vmem:[%s2264_s1 + $0x30] sm:$0xff] }
  0x44   : > { %1230 = vmatpush1.bf16.msra.mxu0 %v1229_v20  ;;  %v239_v50 = vld [vmem:[%s2264_s1 + $0x38] sm:$0xff]  ;;  %v240_v51 = vld [vmem:[%s2264_s1 + $0x40] sm:$0xff]  ;;  %v241_v52 = vld [vmem:[%s2264_s1 + $0x48] sm:$0xff]  ;;  %p1413_p2 = pnand %p1412_p0, %p1406_p13 }
  0x45   : > { %1232 = vmatprep.subr.bf16.mxu0 %v1231_v21  ;;  %v242_v53 = vld [vmem:[%s2264_s1 + $0x50] sm:$0xff]  ;;  %v243_v54 = vld [vmem:[%s2264_s1 + $0x58] sm:$0xff] }
  0x48   : > { %1234 = vmatpush1.bf16.msra.mxu0 %v1233_v26 }
  0x49   : > { %1236 = vmatprep.subr.bf16.mxu0 %v1235_v27 }
  0x4c   : > { %1238 = vmatpush1.bf16.msra.mxu0 %v1237_v32 }
  0x4d   : > { %1240 = vmatprep.subr.bf16.mxu0 %v1239_v33 }
  0x50   : > { %1242 = vmatpush1.bf16.msra.mxu0 %v1241_v38 }
  0x51   : > { %1244 = vmatprep.subr.bf16.mxu0 %v1243_v39 }
  0x54   : > { %1246 = vmatpush1.bf16.msra.mxu0 %v1245_v42 }
  0x57   : > { %1197 = vmatmul.mubr.msk.f32.vlgmr.msra.gmra.mrb[0].mxu0 %vm276_vm0, %v232_v43 }
  0x58   : > { %383 = vmatprep.mubr.f32.mxu0 %v2269_v0 }
  0x5b   : > { %1198 = vmatmul.mubr.msk.f32.gmra.mrb[2].mxu0 %vm276_vm0, %v233_v44 }
  0x5c   : > { %389 = vmatprep.mubr.f32.mxu0 %v2269_v0 }
  0x5f   : > { %1199 = vmatmul.mubr.msk.f32.gmra.mrb[4].mxu0 %vm276_vm0, %v234_v45 }
  0x60   : > { %395 = vmatprep.mubr.f32.mxu0 %v2269_v0 }
  0x63   : > { %1200 = vmatmul.mubr.msk.f32.gmra.mrb[6].mxu0 %vm276_vm0, %v235_v46 }
  0x64   : > { %401 = vmatprep.mubr.f32.mxu0 %v2269_v0 }
  0x67   : > { %1201 = vmatmul.mubr.msk.f32.gmra.mrb[8].mxu0 %vm276_vm0, %v236_v47 }
  0x68   : > { %407 = vmatprep.mubr.f32.mxu0 %v2269_v0 }
  0x6b   : > { %1202 = vmatmul.mubr.msk.f32.gmra.mrb[10].mxu0 %vm276_vm0, %v237_v48 }
  0x6c   : > { %413 = vmatprep.mubr.f32.mxu0 %v2269_v0 }
  0x6f   : > { %1203 = vmatmul.mubr.msk.f32.gmra.mrb[12].mxu0 %vm276_vm0, %v238_v49 }
  0x70   : > { %419 = vmatprep.mubr.f32.mxu0 %v2269_v0 }
  0x73   : > { %1204 = vmatmul.mubr.msk.f32.gmra.mrb[14].mxu0 %vm276_vm0, %v239_v50 }
  0x74   : > { %425 = vmatprep.mubr.f32.mxu0 %v2269_v0 }
  0x77   : > { %1205 = vmatmul.mubr.msk.f32.gmra.mrb[16].mxu0 %vm276_vm0, %v240_v51 }
  0x78   : > { %431 = vmatprep.mubr.f32.mxu0 %v2269_v0 }
  0x7b   : > { %1206 = vmatmul.mubr.msk.f32.gmra.mrb[18].mxu0 %vm276_vm0, %v241_v52 }
  0x7c   : > { %437 = vmatprep.mubr.f32.mxu0 %v2269_v0 }
  0x7f   : > { %1207 = vmatmul.mubr.msk.f32.gmra.mrb[20].mxu0 %vm276_vm0, %v242_v53 }
  0x80   : > { %443 = vmatprep.mubr.f32.mxu0 %v2269_v0 }
  0x83   : > { %1208 = vmatmul.mubr.msk.f32.gmra.mrb[22].mxu0 %vm276_vm0, %v243_v54 }
 0x12a   : > { %v1704_v56 = vpop.f32.mrb[0].mxu0 }
 0x12b   : > { %v1706_v57 = vpop.f32.mrb[1].mxu0  ;;  %v486_v58 = vmul.f32 %v1704_v56, %v1704_v56 }
 0x12c   : > { %v450_v59 = vadd.f32 %v1706_v57, %v1704_v56  ;;  %v487_v60 = vmul.f32 %v1706_v57, %v1706_v57 }
 0x12e   : > { %451 = vadd.xlane.f32.xlu0 %v450_v59  ;;  %v1714_v61 = vpop.f32.mrb[2].mxu0  ;;  %v510_v62 = vadd.f32 %v487_v60, %v486_v58 }
 0x12f   : > { %v1716_v63 = vpop.f32.mrb[3].mxu0  ;;  %v488_v1 = vmul.f32 %v1714_v61, %v1714_v61 }
 0x130   : > { %511 = vadd.xlane.f32.xlu1 %v510_v62  ;;  %v453_v2 = vadd.f32 %v1716_v63, %v1714_v61  ;;  %v489_v3 = vmul.f32 %v1716_v63, %v1716_v63 }
 0x132   : > { %454 = vadd.xlane.f32.xlu0 %v453_v2  ;;  %v1724_v4 = vpop.f32.mrb[4].mxu0  ;;  %v513_v5 = vadd.f32 %v489_v3, %v488_v1 }
 0x133   : > { %v1726_v6 = vpop.f32.mrb[5].mxu0  ;;  %v490_v7 = vmul.f32 %v1724_v4, %v1724_v4 }
 0x134   : > { %514 = vadd.xlane.f32.xlu1 %v513_v5  ;;  %v456_v8 = vadd.f32 %v1726_v6, %v1724_v4  ;;  %v491_v9 = vmul.f32 %v1726_v6, %v1726_v6 }
 0x136   : > { %457 = vadd.xlane.f32.xlu0 %v456_v8  ;;  %v1734_v10 = vpop.f32.mrb[6].mxu0  ;;  %v516_v11 = vadd.f32 %v491_v9, %v490_v7  ;;  %v1827_v9 = vld [vmem:[%s2266_s3] sm:$0xff] }
 0x137   : > { %v1736_v12 = vpop.f32.mrb[7].mxu0  ;;  %v492_v13 = vmul.f32 %v1734_v10, %v1734_v10 }
 0x138   : > { %v459_v14 = vadd.f32 %v1736_v12, %v1734_v10  ;;  %v493_v15 = vmul.f32 %v1736_v12, %v1736_v12 }
 0x13a   : > { %517 = vadd.xlane.f32.xlu0 %v516_v11  ;;  %460 = vadd.xlane.f32.xlu1 %v459_v14  ;;  %v1744_v16 = vpop.f32.mrb[8].mxu0  ;;  %v519_v17 = vadd.f32 %v493_v15, %v492_v13  ;;  %v1833_v11 = vld [vmem:[%s2266_s3 + $0x28] sm:$0xff]  ;;  %v1839_v13 = vld [vmem:[%s2266_s3 + $0x30] sm:$0xff]  ;;  %v2271_v14 = vmov 0  }
 0x13b   : > { %v1746_v18 = vpop.f32.mrb[9].mxu0  ;;  %v494_v19 = vmul.f32 %v1744_v16, %v1744_v16  ;;  %v1846_v15 = vld [vmem:[%s2266_s3 + $0x8] sm:$0xff] }
 0x13c   : > { %v462_v20 = vadd.f32 %v1746_v18, %v1744_v16  ;;  %v495_v21 = vmul.f32 %v1746_v18, %v1746_v18 }
 0x13e   : > { %520 = vadd.xlane.f32.xlu1 %v519_v17  ;;  %463 = vadd.xlane.f32.xlu0 %v462_v20  ;;  %v1754_v22 = vpop.f32.mrb[10].mxu0  ;;  %v522_v23 = vadd.f32 %v495_v21, %v494_v19  ;;  %v1852_v17 = vld [vmem:[%s2266_s3 + $0x10] sm:$0xff]  ;;  %v1858_v19 = vld [vmem:[%s2266_s3 + $0x18] sm:$0xff]  ;;  %v1864_v20 = vld [vmem:[%s2266_s3 + $0x20] sm:$0xff] }
 0x13f   : > { %v1756_v24 = vpop.f32.mrb[11].mxu0  ;;  %v496_v25 = vmul.f32 %v1754_v22, %v1754_v22  ;;  %v1870_v21 = vld [vmem:[%s2266_s3 + $0x38] sm:$0xff] }
 0x140   : > { %v465_v26 = vadd.f32 %v1756_v24, %v1754_v22  ;;  %v497_v27 = vmul.f32 %v1756_v24, %v1756_v24 }
 0x142   : > { %523 = vadd.xlane.f32.xlu0 %v522_v23  ;;  %466 = vadd.xlane.f32.xlu1 %v465_v26  ;;  %v1764_v28 = vpop.f32.mrb[12].mxu0  ;;  %v525_v29 = vadd.f32 %v497_v27, %v496_v25  ;;  %v1876_v23 = vld [vmem:[%s2266_s3 + $0x40] sm:$0xff] }
 0x143   : > { %v1766_v30 = vpop.f32.mrb[13].mxu0  ;;  %v498_v31 = vmul.f32 %v1764_v28, %v1764_v28 }
 0x144   : > { %v468_v32 = vadd.f32 %v1766_v30, %v1764_v28  ;;  %v499_v33 = vmul.f32 %v1766_v30, %v1766_v30 }
 0x146   : > { %526 = vadd.xlane.f32.xlu1 %v525_v29  ;;  %469 = vadd.xlane.f32.xlu0 %v468_v32  ;;  %v1774_v34 = vpop.f32.mrb[14].mxu0  ;;  %v528_v35 = vadd.f32 %v499_v33, %v498_v31 }
 0x147   : > { %v1776_v36 = vpop.f32.mrb[15].mxu0  ;;  %v500_v37 = vmul.f32 %v1774_v34, %v1774_v34 }
 0x148   : > { %v471_v38 = vadd.f32 %v1776_v36, %v1774_v34  ;;  %v501_v39 = vmul.f32 %v1776_v36, %v1776_v36 }
 0x14a   : > { %529 = vadd.xlane.f32.xlu0 %v528_v35  ;;  %472 = vadd.xlane.f32.xlu1 %v471_v38  ;;  %v1784_v40 = vpop.f32.mrb[16].mxu0  ;;  %v531_v41 = vadd.f32 %v501_v39, %v500_v37 }
 0x14b   : > { %v1786_v42 = vpop.f32.mrb[17].mxu0  ;;  %v502_v43 = vmul.f32 %v1784_v40, %v1784_v40 }
 0x14c   : > { %v474_v44 = vadd.f32 %v1786_v42, %v1784_v40  ;;  %v503_v45 = vmul.f32 %v1786_v42, %v1786_v42 }
 0x14e   : > { %532 = vadd.xlane.f32.xlu1 %v531_v41  ;;  %475 = vadd.xlane.f32.xlu0 %v474_v44  ;;  %v1794_v46 = vpop.f32.mrb[18].mxu0  ;;  %v534_v47 = vadd.f32 %v503_v45, %v502_v43 }
 0x14f   : > { %v1796_v48 = vpop.f32.mrb[19].mxu0  ;;  %v504_v49 = vmul.f32 %v1794_v46, %v1794_v46 }
 0x150   : > { %v477_v50 = vadd.f32 %v1796_v48, %v1794_v46  ;;  %v505_v51 = vmul.f32 %v1796_v48, %v1796_v48 }
 0x152   : > { %535 = vadd.xlane.f32.xlu0 %v534_v47  ;;  %478 = vadd.xlane.f32.xlu1 %v477_v50  ;;  %v1804_v52 = vpop.f32.mrb[20].mxu0  ;;  %v537_v53 = vadd.f32 %v505_v51, %v504_v49 }
 0x153   : > { %v1806_v54 = vpop.f32.mrb[21].mxu0  ;;  %v506_v58 = vmul.f32 %v1804_v52, %v1804_v52 }
 0x154   : > { %v480_v59 = vadd.f32 %v1806_v54, %v1804_v52  ;;  %v507_v60 = vmul.f32 %v1806_v54, %v1806_v54 }
 0x156   : > { %538 = vadd.xlane.f32.xlu1 %v537_v53  ;;  %481 = vadd.xlane.f32.xlu0 %v480_v59  ;;  %v540_v62 = vadd.f32 %v507_v60, %v506_v58  ;;  %v1814_v1 = vpop.f32.mrb[22].mxu0 }
 0x157   : > { %v1816_v2 = vpop.f32.mrb[23].mxu0  ;;  %v508_v3 = vmul.f32 %v1814_v1, %v1814_v1 }
 0x158   : > { %v509_v5 = vmul.f32 %v1816_v2, %v1816_v2  ;;  %v483_v7 = vadd.f32 %v1816_v2, %v1814_v1 }
 0x15a   : > { %541 = vadd.xlane.f32.xlu0 %v540_v62  ;;  %v543_v8 = vadd.f32 %v509_v5, %v508_v3 }
 0x167   : > { %752 = vperm.xlu1 %1327, %v1827_v9  }
 0x170   : > { %777 = vperm.xlu0 %1328, %v1833_v11  }
 0x174   : > { %782 = vperm.xlu0 %1328, %v1839_v13  }
 0x178   : > { %1329 = vset.pattern.permute.xlu0 %v2271_v14 }
 0x18b   : > { %484 = vadd.xlane.f32.xlu1 %v483_v7 }
 0x18f   : > { %544 = vadd.xlane.f32.xlu1 %v543_v8 }
 0x1a0   : > { %757 = vperm.xlu1 %1327, %v1846_v15  }
 0x1a4   : > { %762 = vperm.xlu1 %1327, %v1852_v17  }
 0x1a8   : > { %767 = vperm.xlu1 %1327, %v1858_v19  }
 0x1ac   : > { %772 = vperm.xlu1 %1327, %v1864_v20  }
 0x1b0   : > { %787 = vperm.xlu1 %1327, %v1870_v21  }
 0x1b4   : > { %792 = vperm.xlu1 %1327, %v1876_v23  }
 0x1b8   : > { %1330 = vset.pattern.permute.xlu1 %v2271_v14 }
 0x1bb   : > { %v452_v25 = vpop.xlane.xlu0 %451 }
 0x1bc   : > { %v1880_v26 = vmul.f32 0.00390625, %v452_v25 }
 0x1bd   : > { %v512_v27 = vpop.xlane.xlu1 %511 }
 0x1be   : > { %v558_v29 = vmul.f32 0.00390625, %v512_v27  ;;  %v570_v31 = vmul.f32 %v1880_v26, %v1880_v26  ;;  %v630_v32 = vsub.f32 %v1704_v56, %v1880_v26  ;;  %v631_v33 = vsub.f32 %v1706_v57, %v1880_v26 }
 0x1bf   : > { %v455_v35 = vpop.xlane.xlu0 %454 }
 0x1c0   : > { %v582_v37 = vsub.f32 %v558_v29, %v570_v31  ;;  %v1888_v38 = vmul.f32 0.00390625, %v455_v35 }
 0x1c1   : > { %v515_v39 = vpop.xlane.xlu1 %514 }
 0x1c2   : > { %v594_v41 = vmax.f32 %v582_v37, 0.0  ;;  %v559_v43 = vmul.f32 0.00390625, %v515_v39  ;;  %v571_v44 = vmul.f32 %v1888_v38, %v1888_v38  ;;  %v632_v45 = vsub.f32 %v1714_v61, %v1888_v38 }
 0x1c3   : > { %v458_v47 = vpop.xlane.xlu0 %457  ;;  %v633_v49 = vsub.f32 %v1716_v63, %v1888_v38 }
 0x1c4   : > { %v606_v50 = vadd.f32 1e-05, %v594_v41  ;;  %v583_v51 = vsub.f32 %v559_v43, %v571_v44  ;;  %v1896_v53 = vmul.f32 0.00390625, %v458_v47 }
 0x1c6   : > { %1341 = vrsqrt.f32 %v606_v50  ;;  %v595_v58 = vmax.f32 %v583_v51, 0.0  ;;  %v634_v59 = vsub.f32 %v1724_v4, %v1896_v53  ;;  %v635_v3 = vsub.f32 %v1726_v6, %v1896_v53 }
 0x1c7   : > { %v518_v60 = vpop.xlane.xlu0 %517  ;;  %v461_v62 = vpop.xlane.xlu1 %460  ;;  %v572_v7 = vmul.f32 %v1896_v53, %v1896_v53 }
 0x1c8   : > { %v607_v5 = vadd.f32 1e-05, %v595_v58  ;;  %v560_v8 = vmul.f32 0.00390625, %v518_v60  ;;  %v1904_v25 = vmul.f32 0.00390625, %v461_v62 }
 0x1ca   : > { %1343 = vrsqrt.f32 %v607_v5  ;;  %v584_v27 = vsub.f32 %v560_v8, %v572_v7  ;;  %v573_v41 = vmul.f32 %v1904_v25, %v1904_v25 }
 0x1cb   : > { %v521_v31 = vpop.xlane.xlu1 %520  ;;  %v464_v35 = vpop.xlane.xlu0 %463 }
 0x1cc   : > { %v596_v39 = vmax.f32 %v584_v27, 0.0  ;;  %v561_v43 = vmul.f32 0.00390625, %v521_v31  ;;  %v1912_v44 = vmul.f32 0.00390625, %v464_v35 }
 0x1ce   : > { %v608_v47 = vadd.f32 1e-05, %v596_v39  ;;  %v585_v50 = vsub.f32 %v561_v43, %v573_v41  ;;  %v574_v58 = vmul.f32 %v1912_v44, %v1912_v44 }
 0x1cf   : > { %v524_v60 = vpop.xlane.xlu0 %523  ;;  %v467_v62 = vpop.xlane.xlu1 %466 }
 0x1d0   : > { %v1342_v7 = vpop.eup %1341  ;;  %1345 = vrsqrt.f32 %v608_v47  ;;  %v597_v8 = vmax.f32 %v585_v50, 0.0  ;;  %v562_v27 = vmul.f32 0.00390625, %v524_v60  ;;  %v1920_v31 = vmul.f32 0.00390625, %v467_v62 }
 0x1d1   : > { %v654_v35 = vmul.f32 %v1342_v7, %v1827_v9 }
 0x1d2   : > { %v609_v39 = vadd.f32 1e-05, %v597_v8  ;;  %v586_v41 = vsub.f32 %v562_v27, %v574_v58  ;;  %v575_v0 = vmul.f32 %v1920_v31, %v1920_v31 }
 0x1d3   : > { %v527_v51 = vpop.xlane.xlu1 %526  ;;  %v470_v37 = vpop.xlane.xlu0 %469  ;;  %668 = vperm.xlu0 %1329, %v654_v35  }
 0x1d4   : > { %v1344_v50 = vpop.eup %1343  ;;  %1347 = vrsqrt.f32 %v609_v39  ;;  %v598_v60 = vmax.f32 %v586_v41, 0.0  ;;  %v563_v62 = vmul.f32 0.00390625, %v527_v51  ;;  %v1929_v5 = vmul.f32 0.00390625, %v470_v37 }
 0x1d5   : > { %v655_v9 = vmul.f32 %v1344_v50, %v1846_v15 }
 0x1d6   : > { %v610_v58 = vadd.f32 1e-05, %v598_v60  ;;  %v587_v7 = vsub.f32 %v563_v62, %v575_v0  ;;  %v576_v27 = vmul.f32 %v1929_v5, %v1929_v5 }
 0x1d7   : > { %v530_v35 = vpop.xlane.xlu0 %529  ;;  %v473_v43 = vpop.xlane.xlu1 %472  ;;  %673 = vperm.xlu1 %1330, %v655_v9  }
 0x1d8   : > { %1349 = vrsqrt.f32 %v610_v58  ;;  %v599_v51 = vmax.f32 %v587_v7, 0.0  ;;  %v564_v37 = vmul.f32 0.00390625, %v530_v35  ;;  %v1938_v41 = vmul.f32 0.00390625, %v473_v43 }
 0x1da   : > { %v1346_v15 = vpop.eup %1345  ;;  %v611_v50 = vadd.f32 1e-05, %v599_v51  ;;  %v588_v0 = vsub.f32 %v564_v37, %v576_v27  ;;  %v577_v62 = vmul.f32 %v1938_v41, %v1938_v41 }
 0x1db   : > { %v533_v8 = vpop.xlane.xlu1 %532  ;;  %v476_v47 = vpop.xlane.xlu0 %475  ;;  %v656_v9 = vmul.f32 %v1346_v15, %v1852_v17 }
 0x1dc   : > { %1351 = vrsqrt.f32 %v611_v50  ;;  %v600_v7 = vmax.f32 %v588_v0, 0.0  ;;  %v565_v43 = vmul.f32 0.00390625, %v533_v8  ;;  %v1947_v35 = vmul.f32 0.00390625, %v476_v47 }
 0x1dd   : > { %678 = vperm.xlu1 %1330, %v656_v9  }
 0x1de   : > { %v1348_v27 = vpop.eup %1347  ;;  %v612_v51 = vadd.f32 1e-05, %v600_v7  ;;  %v589_v37 = vsub.f32 %v565_v43, %v577_v62  ;;  %v578_v39 = vmul.f32 %v1947_v35, %v1947_v35 }
 0x1df   : > { %v536_v29 = vpop.xlane.xlu0 %535  ;;  %v479_v17 = vpop.xlane.xlu1 %478  ;;  %v657_v15 = vmul.f32 %v1348_v27, %v1858_v19 }
 0x1e0   : > { %1353 = vrsqrt.f32 %v612_v51  ;;  %v601_v47 = vmax.f32 %v589_v37, 0.0  ;;  %v566_v8 = vmul.f32 0.00390625, %v536_v29  ;;  %v1956_v0 = vmul.f32 0.00390625, %v479_v17 }
 0x1e1   : > { %683 = vperm.xlu1 %1330, %v657_v15  }
 0x1e2   : > { %v1350_v62 = vpop.eup %1349  ;;  %v613_v9 = vadd.f32 1e-05, %v601_v47  ;;  %v590_v7 = vsub.f32 %v566_v8, %v578_v39  ;;  %v579_v60 = vmul.f32 %v1956_v0, %v1956_v0 }
 0x1e3   : > { %v539_v58 = vpop.xlane.xlu1 %538  ;;  %v482_v19 = vpop.xlane.xlu0 %481  ;;  %v658_v27 = vmul.f32 %v1350_v62, %v1864_v20 }
 0x1e4   : > { %1355 = vrsqrt.f32 %v613_v9  ;;  %v602_v29 = vmax.f32 %v590_v7, 0.0  ;;  %v567_v37 = vmul.f32 0.00390625, %v539_v58  ;;  %v1965_v17 = vmul.f32 0.00390625, %v482_v19 }
 0x1e5   : > { %688 = vperm.xlu1 %1330, %v658_v27  }
 0x1e6   : > { %v1352_v39 = vpop.eup %1351  ;;  %v614_v15 = vadd.f32 1e-05, %v602_v29  ;;  %v591_v47 = vsub.f32 %v567_v37, %v579_v60  ;;  %v580_v8 = vmul.f32 %v1965_v17, %v1965_v17  ;;  %v225_v29 = vld [vmem:[%s2266_s3 + $0x48] sm:$0xff] }
 0x1e7   : > { %v542_v50 = vpop.xlane.xlu0 %541  ;;  %v659_v20 = vmul.f32 %v1352_v39, %v1833_v11 }
 0x1e8   : > { %1357 = vrsqrt.f32 %v614_v15  ;;  %v603_v58 = vmax.f32 %v591_v47, 0.0  ;;  %v568_v9 = vmul.f32 0.00390625, %v542_v50 }
 0x1e9   : > { %693 = vperm.xlu0 %1329, %v659_v20   ;;  %v226_v20 = vld [vmem:[%s2266_s3 + $0x50] sm:$0xff] }
 0x1ea   : > { %v1354_v7 = vpop.eup %1353  ;;  %v615_v19 = vadd.f32 1e-05, %v603_v58  ;;  %v592_v27 = vsub.f32 %v568_v9, %v580_v8  ;;  %v753_v9 = vpop.permute.xlu1 %752 }
 0x1eb   : > { %v660_v60 = vmul.f32 %v1354_v7, %v1839_v13 }
 0x1ec   : > { %1359 = vrsqrt.f32 %v615_v19  ;;  %v604_v37 = vmax.f32 %v592_v27, 0.0 }
 0x1ed   : > { %698 = vperm.xlu1 %1330, %v660_v60   ;;  %1331 = vset.pattern.permute.xlu0 %v2272_v55 }
 0x1ee   : > { %v1356_v11 = vpop.eup %1355  ;;  %v616_v39 = vadd.f32 1e-05, %v604_v37  ;;  %797 = vperm.xlu0 %1331, %v225_v29  }
 0x1ef   : > { %v661_v50 = vmul.f32 %v1356_v11, %v1870_v21 }
 0x1f0   : > { %1361 = vrsqrt.f32 %v616_v39 }
 0x1f1   : > { %703 = vperm.xlu1 %1330, %v661_v50  }
 0x1f2   : > { %v1358_v15 = vpop.eup %1357  ;;  %1332 = vset.pattern.permute.xlu0 %v2271_v14 }
 0x1f3   : > { %v662_v13 = vmul.f32 %v1358_v15, %v1876_v23  ;;  %v227_v15 = vld [vmem:[%s2266_s3 + $0x58] sm:$0xff] }
 0x1f5   : > { %708 = vperm.xlu0 %1332, %v662_v13  }
 0x1f6   : > { %v1360_v47 = vpop.eup %1359 }
 0x1f7   : > { %v663_v8 = vmul.f32 %v1360_v47, %v225_v29 }
 0x1f9   : > { %713 = vperm.xlu1 %1330, %v663_v8   ;;  %1333 = vset.pattern.permute.xlu0 %v2272_v55 }
 0x1fa   : > { %v1362_v58 = vpop.eup %1361  ;;  %802 = vperm.xlu0 %1333, %v226_v20  }
 0x1fb   : > { %v664_v21 = vmul.f32 %v1362_v58, %v226_v20 }
 0x1fd   : > { %718 = vperm.xlu1 %1330, %v664_v21  }
 0x1fe   : > { %1336 = vset.pattern.permute.xlu0 %v2271_v14 }
 0x218   : > { %v485_v7 = vpop.xlane.xlu1 %484 }
 0x219   : > { %v1987_v19 = vmul.f32 0.00390625, %v485_v7  ;;  %v778_v7 = vpop.permute.xlu0 %777 }
 0x21b   : > { %v581_v29 = vmul.f32 %v1987_v19, %v1987_v19 }
 0x21c   : > { %v545_v60 = vpop.xlane.xlu1 %544 }
 0x21d   : > { %v569_v37 = vmul.f32 0.00390625, %v545_v60 }
 0x21f   : > { %v593_v11 = vsub.f32 %v569_v37, %v581_v29  ;;  %v783_v29 = vpop.permute.xlu0 %782 }
 0x220   : > { %v758_v8 = vpop.permute.xlu1 %757 }
 0x221   : > { %v605_v39 = vmax.f32 %v593_v11, 0.0 }
 0x223   : > { %v617_v50 = vadd.f32 1e-05, %v605_v39 }
 0x224   : > { %v763_v20 = vpop.permute.xlu1 %762 }
 0x225   : > { %1363 = vrsqrt.f32 %v617_v50 }
 0x228   : > { %v768_v58 = vpop.permute.xlu1 %767 }
 0x22c   : > { %v773_v21 = vpop.permute.xlu1 %772 }
 0x22f   : > { %v1364_v13 = vpop.eup %1363 }
 0x230   : > { %v665_v47 = vmul.f32 %v1364_v13, %v227_v15  ;;  %v2000_v60 = vpop.permute.xlu1 %787 }
 0x232   : > { %723 = vperm.xlu1 %1330, %v665_v47  }
 0x234   : > { %v2002_v37 = vpop.permute.xlu1 %792 }
 0x236   : > { %1334 = vset.pattern.permute.xlu1 %v2272_v55 }
 0x237   : > { %807 = vperm.xlu1 %1334, %v227_v15  }
 0x23b   : > { %1335 = vset.pattern.permute.xlu1 %v2271_v14 }
 0x252   : > { %v669_v11 = vpop.permute.xlu0 %668 }
 0x253   : > { %v726_v39 = vmul.f32 %v669_v11, %v630_v32  ;;  %v727_v50 = vmul.f32 %v669_v11, %v631_v33 }
 0x255   : > { %v810_v15 = vadd.f32 %v753_v9, %v726_v39  ;;  %v811_v13 = vadd.f32 %v753_v9, %v727_v50  ;;  %v2283_v50 = vsub.f32 %v1756_v24, %v1920_v31 }
 0x256   : > { %v674_v47 = vpop.permute.xlu1 %673 }
 0x257   : > { %v728_v14 = vmul.f32 %v674_v47, %v632_v45  ;;  %v729_v55 = vmul.f32 %v674_v47, %v633_v49  ;;  %v835_v62 = vmax.f32 %v811_v13, 0.0  ;;  %v834_v32 = vmax.f32 %v810_v15, 0.0 }
 0x258   : > { %v2279_v49 = vsub.f32 %v1736_v12, %v1904_v25 }
 0x259   : > { %v812_v27 = vadd.f32 %v758_v8, %v728_v14  ;;  %v813_v23 = vadd.f32 %v758_v8, %v729_v55  ;;  %v2278_v55 = vsub.f32 %v1734_v10, %v1904_v25 }
 0x25b   : > { %v837_v56 = vmax.f32 %v813_v23, 0.0  ;;  %v836_v43 = vmax.f32 %v812_v27, 0.0  ;;  %v2281_v27 = vsub.f32 %v1746_v18, %v1912_v44 }
 0x25c   : > { %v679_v51 = vpop.permute.xlu1 %678 }
 0x25d   : > { %v730_v57 = vmul.f32 %v679_v51, %v634_v59  ;;  %v731_v61 = vmul.f32 %v679_v51, %v635_v3  ;;  %v1247_v26 = vpack.c.bf16 %v837_v56, %v835_v62  ;;  %v1249_v33 = vpack.c.bf16 %v836_v43, %v834_v32 }
 0x25e   : > { %v2280_v51 = vsub.f32 %v1744_v16, %v1912_v44 }
 0x25f   : > { %1248 = vmatprep.subr.bf16.mxu1 %v1247_v26  ;;  %v814_v63 = vadd.f32 %v763_v20, %v730_v57  ;;  %v815_v38 = vadd.f32 %v763_v20, %v731_v61 }
 0x260   : > { %v684_v14 = vpop.permute.xlu1 %683  ;;  %1250 = vmatpush1.bf16.msra.mxu1 %v1249_v33 }
 0x261   : > { %v732_v45 = vmul.f32 %v684_v14, %v2278_v55  ;;  %v733_v4 = vmul.f32 %v684_v14, %v2279_v49  ;;  %v838_v23 = vmax.f32 %v814_v63, 0.0  ;;  %v839_v6 = vmax.f32 %v815_v38, 0.0 }
 0x262   : > { %v2287_v55 = vsub.f32 %v1776_v36, %v1938_v41 }
 0x263   : > { %v816_v59 = vadd.f32 %v768_v58, %v732_v45  ;;  %v817_v9 = vadd.f32 %v768_v58, %v733_v4  ;;  %v2282_v58 = vsub.f32 %v1754_v22, %v1920_v31  ;;  %v2285_v22 = vsub.f32 %v1766_v30, %v1929_v5 }
 0x264   : > { %v689_v53 = vpop.permute.xlu1 %688 }
 0x265   : > { %v840_v3 = vmax.f32 %v816_v59, 0.0  ;;  %v841_v43 = vmax.f32 %v817_v9, 0.0  ;;  %v734_v62 = vmul.f32 %v689_v53, %v2280_v51  ;;  %v735_v10 = vmul.f32 %v689_v53, %v2281_v27 }
 0x266   : > { %v2288_v9 = vsub.f32 %v1784_v40, %v1947_v35 }
 0x267   : > { %v1251_v8 = vpack.c.bf16 %v841_v43, %v839_v6  ;;  %v1253_v20 = vpack.c.bf16 %v840_v3, %v838_v23  ;;  %v818_v11 = vadd.f32 %v773_v21, %v734_v62  ;;  %v819_v12 = vadd.f32 %v773_v21, %v735_v10 }
 0x268   : > { %v694_v25 = vpop.permute.xlu0 %693  ;;  %v2284_v21 = vsub.f32 %v1764_v28, %v1929_v5  ;;  %v2289_v23 = vsub.f32 %v1786_v42, %v1947_v35  ;;  %v2290_v43 = vsub.f32 %v1794_v46, %v1956_v0  ;;  %v2291_v62 = vsub.f32 %v1796_v48, %v1956_v0 }
 0x269   : > { %v736_v39 = vmul.f32 %v694_v25, %v2282_v58  ;;  %v737_v15 = vmul.f32 %v694_v25, %v2283_v50  ;;  %1252 = vmatprep.subr.bf16.mxu1 %v1251_v8  ;;  %v842_v47 = vmax.f32 %v818_v11, 0.0  ;;  %v843_v18 = vmax.f32 %v819_v12, 0.0 }
 0x26a   : > { %1254 = vmatpush1.bf16.msra.mxu1 %v1253_v20  ;;  %v2292_v46 = vsub.f32 %v1804_v52, %v1965_v17  ;;  %v2293_v48 = vsub.f32 %v1806_v54, %v1965_v17 }
 0x26b   : > { %v820_v16 = vadd.f32 %v778_v7, %v736_v39  ;;  %v821_v13 = vadd.f32 %v778_v7, %v737_v15  ;;  %v2286_v7 = vsub.f32 %v1774_v34, %v1938_v41 }
 0x26c   : > { %v699_v44 = vpop.permute.xlu1 %698 }
 0x26d   : > { %v844_v56 = vmax.f32 %v820_v16, 0.0  ;;  %v845_v32 = vmax.f32 %v821_v13, 0.0  ;;  %v738_v57 = vmul.f32 %v699_v44, %v2284_v21  ;;  %v739_v61 = vmul.f32 %v699_v44, %v2285_v22  ;;  %v798_v26 = vpop.permute.xlu0 %797 }
 0x26e   : > { %v2294_v16 = vsub.f32 %v1814_v1, %v1987_v19  ;;  %v244_v1 = vld [vmem:[%s2265_s2] sm:$0xff] }
 0x26f   : > { %v1255_v24 = vpack.c.bf16 %v845_v32, %v843_v18  ;;  %v1257_v31 = vpack.c.bf16 %v844_v56, %v842_v47  ;;  %v822_v33 = vadd.f32 %v783_v29, %v738_v57  ;;  %v823_v63 = vadd.f32 %v783_v29, %v739_v61 }
 0x270   : > { %v704_v38 = vpop.permute.xlu1 %703  ;;  %v2295_v47 = vsub.f32 %v1816_v2, %v1987_v19  ;;  %v2296_v61 = vmov 0.0   ;;  %v245_v2 = vld [vmem:[%s2265_s2 + $0x8] sm:$0xff]  ;;  %v246_v19 = vld [vmem:[%s2265_s2 + $0x10] sm:$0xff] }
 0x271   : > { %v740_v14 = vmul.f32 %v704_v38, %v2286_v7  ;;  %v741_v45 = vmul.f32 %v704_v38, %v2287_v55  ;;  %1256 = vmatprep.subr.bf16.mxu1 %v1255_v24  ;;  %v846_v5 = vmax.f32 %v822_v33, 0.0  ;;  %v847_v49 = vmax.f32 %v823_v63, 0.0 }
 0x272   : > { %1258 = vmatpush1.bf16.msra.mxu1 %v1257_v31 }
 0x273   : > { %v824_v28 = vadd.f32 %v2000_v60, %v740_v14  ;;  %v825_v30 = vadd.f32 %v2000_v60, %v741_v45 }
 0x274   : > { %v709_v4 = vpop.permute.xlu0 %708 }
 0x275   : > { %v848_v59 = vmax.f32 %v824_v28, 0.0  ;;  %v849_v29 = vmax.f32 %v825_v30, 0.0  ;;  %v742_v34 = vmul.f32 %v709_v4, %v2288_v9  ;;  %v743_v36 = vmul.f32 %v709_v4, %v2289_v23 }
 0x277   : > { %v1259_v41 = vpack.c.bf16 %v849_v29, %v847_v49  ;;  %v1261_v6 = vpack.c.bf16 %v848_v59, %v846_v5  ;;  %v826_v3 = vadd.f32 %v2002_v37, %v742_v34  ;;  %v827_v60 = vadd.f32 %v2002_v37, %v743_v36 }
 0x278   : > { %v714_v53 = vpop.permute.xlu1 %713 }
 0x279   : > { %v744_v51 = vmul.f32 %v714_v53, %v2290_v43  ;;  %v745_v40 = vmul.f32 %v714_v53, %v2291_v62  ;;  %1260 = vmatprep.subr.bf16.mxu1 %v1259_v41  ;;  %v850_v35 = vmax.f32 %v826_v3, 0.0  ;;  %v851_v10 = vmax.f32 %v827_v60, 0.0  ;;  %v803_v39 = vpop.permute.xlu0 %802 }
 0x27a   : > { %1262 = vmatpush1.bf16.msra.mxu1 %v1261_v6 }
 0x27b   : > { %v828_v27 = vadd.f32 %v798_v26, %v744_v51  ;;  %v829_v42 = vadd.f32 %v798_v26, %v745_v40  ;;  %v247_v26 = vld [vmem:[%s2265_s2 + $0x18] sm:$0xff] }
 0x27c   : > { %v719_v37 = vpop.permute.xlu1 %718 }
 0x27d   : > { %v852_v8 = vmax.f32 %v828_v27, 0.0  ;;  %v853_v20 = vmax.f32 %v829_v42, 0.0  ;;  %v746_v25 = vmul.f32 %v719_v37, %v2292_v46  ;;  %v747_v0 = vmul.f32 %v719_v37, %v2293_v48 }
 0x27f   : > { %v1263_v11 = vpack.c.bf16 %v853_v20, %v851_v10  ;;  %v1265_v12 = vpack.c.bf16 %v852_v8, %v850_v35  ;;  %v830_v50 = vadd.f32 %v803_v39, %v746_v25  ;;  %v831_v15 = vadd.f32 %v803_v39, %v747_v0 }
 0x281   : > { %1264 = vmatprep.subr.bf16.mxu1 %v1263_v11  ;;  %v854_v32 = vmax.f32 %v830_v50, 0.0  ;;  %v855_v21 = vmax.f32 %v831_v15, 0.0 }
 0x282   : > { %1266 = vmatpush1.bf16.msra.mxu1 %v1265_v12 }
 0x2b1   : > { %v724_v58 = vpop.permute.xlu1 %723 }
 0x2b2   : > { %v748_v13 = vmul.f32 %v724_v58, %v2294_v16  ;;  %v749_v18 = vmul.f32 %v724_v58, %v2295_v47 }
 0x2b6   : > { %v808_v44 = vpop.permute.xlu1 %807 }
 0x2b7   : > { %v832_v56 = vadd.f32 %v808_v44, %v748_v13  ;;  %v833_v52 = vadd.f32 %v808_v44, %v749_v18 }
 0x2b9   : > { %v856_v57 = vmax.f32 %v832_v56, 0.0  ;;  %v857_v54 = vmax.f32 %v833_v52, 0.0 }
 0x2bb   : > { %v1267_v17 = vpack.c.bf16 %v857_v54, %v855_v21  ;;  %v1269_v22 = vpack.c.bf16 %v856_v57, %v854_v32 }
 0x2bd   : > { %1268 = vmatprep.subr.bf16.mxu1 %v1267_v17 }
 0x2be   : > { %1270 = vmatpush1.bf16.msra.mxu1 %v1269_v22 }
 0x2c1   : > { %1209 = vmatmul.mubr.msk.f32.vlgmr.msra.gmra.mrb[0].mxu1 %vm858_vm1, %v244_v1 }
 0x2c2   : > { %941 = vmatprep.mubr.f32.mxu1 %v2296_v61 }
 0x2c5   : > { %1210 = vmatmul.mubr.msk.f32.gmra.mrb[2].mxu1 %vm858_vm1, %v245_v2 }
 0x2c6   : > { %947 = vmatprep.mubr.f32.mxu1 %v2296_v61 }
 0x2c9   : > { %1211 = vmatmul.mubr.msk.f32.gmra.mrb[4].mxu1 %vm858_vm1, %v246_v19 }
 0x2ca   : > { %953 = vmatprep.mubr.f32.mxu1 %v2296_v61  ;;  %v228_v61 = vld [vmem:[%s2266_s3 + $0x60] sm:$0xff] }
 0x2cd   : > { %1212 = vmatmul.mubr.msk.f32.gmra.mrb[6].mxu1 %vm858_vm1, %v247_v26 }
 0x394   : > { %v2095_v24 = vpop.f32.mrb[0].mxu1 }
 0x395   : > { %v2097_v31 = vpop.f32.mrb[1].mxu1  ;;  %v972_v33 = vmul.f32 %v2095_v24, %v2095_v24 }
 0x396   : > { %v960_v63 = vadd.f32 %v2097_v31, %v2095_v24  ;;  %v973_v38 = vmul.f32 %v2097_v31, %v2097_v31 }
 0x398   : > { %961 = vadd.xlane.f32.xlu0 %v960_v63  ;;  %v2105_v7 = vpop.f32.mrb[2].mxu1  ;;  %v980_v14 = vadd.f32 %v973_v38, %v972_v33  ;;  %v229_v38 = vld [vmem:[%s2266_s3 + $0x68] sm:$0xff] }
 0x399   : > { %v2107_v55 = vpop.f32.mrb[3].mxu1  ;;  %v974_v45 = vmul.f32 %v2105_v7, %v2105_v7 }
 0x39a   : > { %981 = vadd.xlane.f32.xlu1 %v980_v14  ;;  %v975_v28 = vmul.f32 %v2107_v55, %v2107_v55  ;;  %v963_v30 = vadd.f32 %v2107_v55, %v2105_v7 }
 0x39c   : > { %v983_v5 = vadd.f32 %v975_v28, %v974_v45  ;;  %v2115_v49 = vpop.f32.mrb[4].mxu1  ;;  %v230_v28 = vld [vmem:[%s2266_s3 + $0x70] sm:$0xff] }
 0x39d   : > { %v2117_v4 = vpop.f32.mrb[5].mxu1  ;;  %v976_v59 = vmul.f32 %v2115_v49, %v2115_v49 }
 0x39e   : > { %984 = vadd.xlane.f32.xlu0 %v983_v5  ;;  %964 = vadd.xlane.f32.xlu1 %v963_v30  ;;  %v966_v29 = vadd.f32 %v2117_v4, %v2115_v49  ;;  %v977_v9 = vmul.f32 %v2117_v4, %v2117_v4 }
 0x3a0   : > { %v2125_v34 = vpop.f32.mrb[6].mxu1  ;;  %v986_v23 = vadd.f32 %v977_v9, %v976_v59  ;;  %v231_v9 = vld [vmem:[%s2266_s3 + $0x78] sm:$0xff] }
 0x3a1   : > { %v2127_v36 = vpop.f32.mrb[7].mxu1  ;;  %v978_v41 = vmul.f32 %v2125_v34, %v2125_v34 }
 0x3a2   : > { %967 = vadd.xlane.f32.xlu0 %v966_v29  ;;  %v979_v6 = vmul.f32 %v2127_v36, %v2127_v36  ;;  %v969_v53 = vadd.f32 %v2127_v36, %v2125_v34  ;;  %987 = vadd.xlane.f32.xlu1 %v986_v23  ;;  %v2298_v29 = vmov 0  }
 0x3a4   : > { %v989_v3 = vadd.f32 %v979_v6, %v978_v41 }
 0x3a6   : > { %970 = vadd.xlane.f32.xlu0 %v969_v53 }
 0x3aa   : > { %990 = vadd.xlane.f32.xlu0 %v989_v3 }
 0x425   : > { %v962_v60 = vpop.xlane.xlu0 %961 }
 0x426   : > { %v2135_v43 = vmul.f32 0.00390625, %v962_v60 }
 0x427   : > { %v982_v51 = vpop.xlane.xlu1 %981 }
 0x428   : > { %v996_v62 = vmul.f32 0.00390625, %v982_v51  ;;  %v1000_v40 = vmul.f32 %v2135_v43, %v2135_v43  ;;  %v1020_v27 = vsub.f32 %v2095_v24, %v2135_v43  ;;  %v1021_v42 = vsub.f32 %v2097_v31, %v2135_v43 }
 0x42a   : > { %v1004_v35 = vsub.f32 %v996_v62, %v1000_v40 }
 0x42b   : > { %v985_v10 = vpop.xlane.xlu0 %984  ;;  %v965_v8 = vpop.xlane.xlu1 %964 }
 0x42c   : > { %v1008_v20 = vmax.f32 %v1004_v35, 0.0  ;;  %v997_v11 = vmul.f32 0.00390625, %v985_v10  ;;  %v2143_v12 = vmul.f32 0.00390625, %v965_v8 }
 0x42e   : > { %v1012_v37 = vadd.f32 1e-05, %v1008_v20  ;;  %v1001_v46 = vmul.f32 %v2143_v12, %v2143_v12  ;;  %v1022_v25 = vsub.f32 %v2105_v7, %v2143_v12  ;;  %v1023_v48 = vsub.f32 %v2107_v55, %v2143_v12 }
 0x42f   : > { %v968_v0 = vpop.xlane.xlu0 %967  ;;  %v988_v58 = vpop.xlane.xlu1 %987  ;;  %v2297_v55 = vmov 1  }
 0x430   : > { %1365 = vrsqrt.f32 %v1012_v37  ;;  %v1005_v39 = vsub.f32 %v997_v11, %v1001_v46  ;;  %v2151_v50 = vmul.f32 0.00390625, %v968_v0  ;;  %v998_v15 = vmul.f32 0.00390625, %v988_v58 }
 0x432   : > { %v1009_v16 = vmax.f32 %v1005_v39, 0.0  ;;  %v1002_v13 = vmul.f32 %v2151_v50, %v2151_v50  ;;  %v1024_v47 = vsub.f32 %v2115_v49, %v2151_v50  ;;  %v1025_v18 = vsub.f32 %v2117_v4, %v2151_v50 }
 0x433   : > { %v971_v44 = vpop.xlane.xlu0 %970 }
 0x434   : > { %v1013_v56 = vadd.f32 1e-05, %v1009_v16  ;;  %v2159_v52 = vmul.f32 0.00390625, %v971_v44  ;;  %v1006_v32 = vsub.f32 %v998_v15, %v1002_v13 }
 0x436   : > { %1367 = vrsqrt.f32 %v1013_v56  ;;  %v1003_v21 = vmul.f32 %v2159_v52, %v2159_v52  ;;  %v1026_v57 = vsub.f32 %v2125_v34, %v2159_v52  ;;  %v1027_v17 = vsub.f32 %v2127_v36, %v2159_v52 }
 0x437   : > { %v991_v54 = vpop.xlane.xlu0 %990  ;;  %v1010_v22 = vmax.f32 %v1006_v32, 0.0 }
 0x438   : > { %v999_v1 = vmul.f32 0.00390625, %v991_v54 }
 0x439   : > { %v1014_v33 = vadd.f32 1e-05, %v1010_v22 }
 0x43a   : > { %v1366_v2 = vpop.eup %1365  ;;  %v1007_v19 = vsub.f32 %v999_v1, %v1003_v21 }
 0x43b   : > { %v1028_v26 = vmul.f32 %v1366_v2, %v228_v61  ;;  %1369 = vrsqrt.f32 %v1014_v33 }
 0x43c   : > { %v1011_v63 = vmax.f32 %v1007_v19, 0.0 }
 0x43d   : > { %1034 = vperm.xlu1 %1335, %v1028_v26  }
 0x43e   : > { %v1015_v14 = vadd.f32 1e-05, %v1011_v63 }
 0x440   : > { %v1368_v7 = vpop.eup %1367  ;;  %1371 = vrsqrt.f32 %v1015_v14 }
 0x441   : > { %1337 = vset.pattern.permute.xlu1 %v2297_v55  ;;  %v1029_v45 = vmul.f32 %v1368_v7, %v229_v38 }
 0x442   : > { %1062 = vperm.xlu1 %1337, %v228_v61  }
 0x443   : > { %1039 = vperm.xlu0 %1336, %v1029_v45  }
 0x445   : > { %v1370_v30 = vpop.eup %1369 }
 0x446   : > { %1067 = vperm.xlu1 %1337, %v229_v38   ;;  %v1030_v5 = vmul.f32 %v1370_v30, %v230_v28 }
 0x447   : > { %1340 = vset.pattern.permute.xlu0 %v2297_v55 }
 0x44a   : > { %1072 = vperm.xlu1 %1337, %v230_v28   ;;  %v1372_v59 = vpop.eup %1371 }
 0x44b   : > { %v1031_v23 = vmul.f32 %v1372_v59, %v231_v9 }
 0x44e   : > { %1338 = vset.pattern.permute.xlu1 %v2298_v29 }
 0x44f   : > { %1044 = vperm.xlu1 %1338, %v1030_v5  }
 0x453   : > { %1049 = vperm.xlu1 %1338, %v1031_v23  }
 0x457   : > { %1339 = vset.pattern.permute.xlu1 %v2297_v55 }
 0x458   : > { %1077 = vperm.xlu1 %1339, %v231_v9  }
 0x4bc   : > { %v1035_v41 = vpop.permute.xlu1 %1034 }
 0x4bd   : > { %v1052_v6 = vmul.f32 %v1035_v41, %v1020_v27  ;;  %v1053_v53 = vmul.f32 %v1035_v41, %v1021_v42 }
 0x4c1   : > { %v1063_v3 = vpop.permute.xlu1 %1062 }
 0x4c2   : > { %v1080_v60 = vadd.f32 %v1063_v3, %v1052_v6  ;;  %v1081_v51 = vadd.f32 %v1063_v3, %v1053_v53  ;;  %v1040_v62 = vpop.permute.xlu0 %1039 }
 0x4c3   : > { %v1054_v40 = vmul.f32 %v1040_v62, %v1022_v25  ;;  %v1055_v35 = vmul.f32 %v1040_v62, %v1023_v48 }
 0x4c4   : > { %v1088_v10 = vmax.f32 %v1080_v60, 0.0  ;;  %v1089_v8 = vmax.f32 %v1081_v51, 0.0 }
 0x4c5   : > { %v1068_v20 = vpop.permute.xlu1 %1067 }
 0x4c6   : > { %1096 = vst [vmem:[%s2190_s7] sm:$0xff] %v1088_v10  ;;  %1097 = vst [vmem:[%s2190_s7 + $0x8] sm:$0xff] %v1089_v8  ;;  %v1082_v24 = vadd.f32 %v1068_v20, %v1054_v40  ;;  %v1083_v31 = vadd.f32 %v1068_v20, %v1055_v35 }
 0x4c8   : > { %v1090_v43 = vmax.f32 %v1082_v24, 0.0  ;;  %v1091_v27 = vmax.f32 %v1083_v31, 0.0 }
 0x4c9   : > { %v1073_v42 = vpop.permute.xlu1 %1072 }
 0x4ca   : > { %1098 = vst [vmem:[%s2190_s7 + $0x10] sm:$0xff] %v1090_v43  ;;  %1099 = vst [vmem:[%s2190_s7 + $0x18] sm:$0xff] %v1091_v27 }
 0x4ce   : > { %v1045_v11 = vpop.permute.xlu1 %1044 }
 0x4cf   : > { %v1056_v12 = vmul.f32 %v1045_v11, %v1024_v47  ;;  %v1057_v37 = vmul.f32 %v1045_v11, %v1025_v18 }
 0x4d1   : > { %v1084_v46 = vadd.f32 %v1073_v42, %v1056_v12  ;;  %v1085_v25 = vadd.f32 %v1073_v42, %v1057_v37 }
 0x4d2   : > { %v1050_v48 = vpop.permute.xlu1 %1049 }
 0x4d3   : > { %v1092_v0 = vmax.f32 %v1084_v46, 0.0  ;;  %v1093_v58 = vmax.f32 %v1085_v25, 0.0  ;;  %v1058_v49 = vmul.f32 %v1050_v48, %v1026_v57  ;;  %v1059_v4 = vmul.f32 %v1050_v48, %v1027_v17 }
 0x4d5   : > { %1100 = vst [vmem:[%s2190_s7 + $0x20] sm:$0xff] %v1092_v0  ;;  %1101 = vst [vmem:[%s2190_s7 + $0x28] sm:$0xff] %v1093_v58 }
 0x4d7   : > { %v1078_v39 = vpop.permute.xlu1 %1077 }
 0x4d8   : > { %v1086_v50 = vadd.f32 %v1078_v39, %v1058_v49  ;;  %v1087_v15 = vadd.f32 %v1078_v39, %v1059_v4 }
 0x4da   : > { %v1094_v34 = vmax.f32 %v1086_v50, 0.0  ;;  %v1095_v16 = vmax.f32 %v1087_v15, 0.0 }
 0x4dc   : > { %1102 = vst [vmem:[%s2190_s7 + $0x30] sm:$0xff] %v1094_v34  ;;  %1103 = vst [vmem:[%s2190_s7 + $0x38] sm:$0xff] %v1095_v16 }
 0x4dd   : > { %1416 = shalt.err (!%p1413_p2)
}
 0x4de   : > { %s1417_s6 = scalar_lea.hbm %s2217_s23, 1024  ;;  %s1421_s14 = scalar_lea.hbm %s2267_s4, 2048 }
 0x4df   : > { %p1418_p4 = scmp.ne.s32.totalorder %s2217_s23, %s1417_s6  ;;  %p1422_p9 = scmp.lt.u32.totalorder %s2217_s23, %s2267_s4 }
 0x4e0   : > { %p1423_p1 = scmp.lt.u32.totalorder %s1421_s14, %s1417_s6  ;;  %p1425_p6 = scmp.lt.u32.totalorder %s1417_s6, %s2217_s23 }
 0x4e1   : > { %p1419_p5 = pnand %p1418_p4, %p2299_p11 }
 0x4e2   : > { %p1424_p3 = por %p1423_p1, %p1422_p9 }
 0x4e3   : > { %p1420_p7 = pneg %p1419_p5 }
 0x4e4   : > { %p1426_p12 = por %p1425_p6, %p1424_p3 }
 0x4e6   : > { %p1427_p13 = pnand %p1426_p12, %p1420_p7 }
 0x4e8   : > { %1430 = shalt.err (!%p1427_p13)
}
 0x4e9   : > { %s1478_s7 = smov 256   ;;  %s1479_s10 = smov 16  }
 0x4ea   : > { %1276 = dma.vmem_to_hbm [thread:$0]  (%p2299_p11), %s2212_s8, 1024, %s2217_s23, %s1105_s28, %s1478_s7, %s1478_s7, %s1479_s10  }
 0x4eb PF: > { %s1133_s11 = sand.u32 1, %s1457_s15   ;;  %p2300_p8 = scmp.ne.s32.totalorder %s2276_s27, 0 }
 0x4ec   : > { %p2301_p10 = scmp.ge.s32.totalorder %s1469_s18, 2  ;;  %s1134_s22 = scalar_lea.sflag [#allocation4], %s1133_s11 }
 0x4ee   : > { %p1283_p0 = pnand %p2301_p10, %p2300_p8 }
 0x4f0   : > { %1452 = dma.done.wait (!%p1283_p0), %s1134_s22, 1024  }
 0x4f1   : > { %1454 = vsyncadd (!%p1283_p0), %s1134_s22, 4294966272  ;;  %p17_p2 = scmp.ge.s32.totalorder %s1530_s21, 4   ;;  %s2302_s15 = smov %s1461_s16 }
 0x4f2   : > { %s2303_s16 = smov %s1465_s17  ;;  %s2304_s17 = smov %s1542_s24 }
 0x4f3   : > { %s2305_s18 = smov %s1530_s21  ;;  %19 = sbr.rel (!%p17_p2) target bundleno = 5 (0x5), region = 81 }
 0x4fa   :  { %1139 = vsyncpa [#allocation3], 1 }
 0x4fb   :  { %1141 = vsyncpa [#allocation3 + $0x1], 1 }
 0x4fc   :  { %1142 = vsyncpa [#allocation4], 1 }
 0x4fd   :  { %1144 = vsyncpa [#allocation4 + $0x1], 1 }

</bundles_post_ra>
